<compile_context>
chip_gen: v7x
topology: tpu7x:2x2x1
jax: 0.10.0
libtpu: 0.0.40
codegen_flags: <defaults>
</compile_context>

<pallas_src>
import functools

import jax
import jax.numpy as jnp
from jax.experimental import pallas as pl
from jax.experimental.pallas import tpu as pltpu


# ----------------------------- kernels --------------------------------------

def mlp_kernel(x_ref, w1_ref, b1_ref, w2_ref, b2_ref, o_ref):
    """Resident-weight path: whole W1/W2 live in VMEM across the batch grid."""
    h = jnp.dot(x_ref[...], w1_ref[...], preferred_element_type=jnp.float32)
    h = jnp.maximum(h + b1_ref[...], 0.0)     # f32 bias + ReLU on the VPU
    # TODO(synk): dropout is identity at inference (training=False); training
    #             mode would use pltpu.prng_seed / pltpu.prng_random_bits + 1/(1-p).
    y = jnp.dot(h.astype(w2_ref.dtype), w2_ref[...],
                preferred_element_type=jnp.float32)
    o_ref[...] = (y + b2_ref[...]).astype(o_ref.dtype)


def mlp_kernel_htiled(x_ref, w1_ref, b1_ref, w2_ref, b2_ref, o_ref, acc_ref):
    """Hidden-dim-tiled fallback for weights too large to keep resident."""
    hi = pl.program_id(1)

    @pl.when(hi == 0)
    def _():
        acc_ref[...] = jnp.zeros_like(acc_ref)

    h = jnp.dot(x_ref[...], w1_ref[...], preferred_element_type=jnp.float32)
    h = jnp.maximum(h + b1_ref[...], 0.0)     # ReLU is elementwise -> tiling hidden is exact
    acc_ref[...] += jnp.dot(h.astype(w2_ref.dtype), w2_ref[...],
                            preferred_element_type=jnp.float32)

    @pl.when(hi == pl.num_programs(1) - 1)
    def _():
        o_ref[...] = (acc_ref[...] + b2_ref[...]).astype(o_ref.dtype)


# ----------------------------- helpers ---------------------------------------

def _round_up(v, m):
    return ((v + m - 1) // m) * m


def _tile_candidates(H):
    """Multiples of 128 that divide H (H is a multiple of 128), descending."""
    n = H // 128
    return [128 * d for d in range(n, 0, -1) if n % d == 0]


def _largest_dividing_tile(H, want):
    for c in _tile_candidates(H):
        if c <= want:
            return c
    return 128


def prepare_params(w1, b1, w2, b2, *, param_dtype=jnp.bfloat16):
    """Pad/cast weights ONCE (call at init, reuse across forward calls).

    Weights are stored as (in_features, out_features) == W.T of PyTorch layout.
    Only the hidden dim is padded (to a multiple of 128).  Zero padding is exact
    because padded b1 entries are 0 and ReLU(0) == 0 (do not reuse this padding
    scheme with an activation where f(0) != 0).
    """
    nNodes, nlhid = w1.shape
    nOut = w2.shape[1]
    H = _round_up(nlhid, 128)
    w1p = jnp.zeros((nNodes, H), param_dtype).at[:, :nlhid].set(w1.astype(param_dtype))
    b1p = jnp.zeros((1, H), jnp.float32).at[0, :nlhid].set(b1.astype(jnp.float32))
    w2p = jnp.zeros((H, nOut), param_dtype).at[:nlhid, :].set(w2.astype(param_dtype))
    b2p = b2.astype(jnp.float32).reshape(1, nOut)
    return w1p, b1p, w2p, b2p


# ----------------------------- forward ---------------------------------------

@functools.partial(jax.jit, static_argnames=("block_b", "hidden_block"))
def mlp_forward(x, w1p, b1p, w2p, b2p, *, block_b=512, hidden_block=None):
    """x: (B, nNodes, 1) -> (B, nOut). Params must come from prepare_params()."""
    x2 = jnp.squeeze(x, axis=2)                       # (B, nNodes)
    B, nNodes = x2.shape
    H = w1p.shape[1]
    nOut = w2p.shape[1]
    in_dtype = w1p.dtype
    out_dtype = x2.dtype                              # keep module's output dtype

    # --- batch tiling: >=2 tiles when B is big enough (v7x megacore), tiny pad
    num_bt = max(1, pl.cdiv(B, block_b))
    if num_bt == 1 and B >= 64:
        num_bt = 2
    TB = _round_up(pl.cdiv(B, num_bt), 8)
    Bp = TB * num_bt

    xin = x2.astype(in_dtype)
    if Bp != B:
        xin = jnp.pad(xin, ((0, Bp - B), (0, 0)))     # zero rows, sliced off below

    # --- generation-aware VMEM budget ----------------------------------------
    try:
        vmem_cap = int(pltpu.get_tpu_info().vmem_capacity_bytes)
    except Exception:
        vmem_cap = 64 << 20                           # conservative (v7x)
    vmem_budget = (vmem_cap * 3) // 4

    itemsize = jnp.dtype(in_dtype).itemsize
    out_itemsize = jnp.dtype(out_dtype).itemsize

    def footprint(TH):
        # Pallas allocates 2 buffers per BlockSpec, even for constant index maps.
        return (2 * TB * nNodes * itemsize                    # x tiles
                + 2 * (nNodes * TH + TH * nOut) * itemsize    # W1, W2 blocks
                + 2 * (TH + nOut) * 4                         # b1, b2 (f32)
                + 2 * TB * nOut * out_itemsize                # out tiles
                + TB * TH * 4 + 2 * TB * nOut * 4             # f32 h + y/acc
                + (2 << 20))                                  # headroom

    # --- resident weights vs. hidden-tiled fallback ---------------------------
    if hidden_block is not None:
        TH = _largest_dividing_tile(H, _round_up(hidden_block, 128))
        h_tiled = True
    elif footprint(H) <= vmem_budget:
        TH, h_tiled = H, False
    else:
        TH = 128
        for cand in _tile_candidates(H):
            if footprint(cand) <= vmem_budget:
                TH = cand
                break
        h_tiled = True
        # TODO(synk): if even TH=128 exceeds the budget, also shrink TB.

    vmem_limit = int(min(max(footprint(TH), 8 << 20), vmem_budget))

    if not h_tiled:
        out = pl.pallas_call(
            mlp_kernel,
            out_shape=jax.ShapeDtypeStruct((Bp, nOut), out_dtype),
            grid_spec=pltpu.PrefetchScalarGridSpec(
                num_scalar_prefetch=0,
                grid=(num_bt,),
                in_specs=[
                    pl.BlockSpec((TB, nNodes), lambda i: (i, 0)),   # x tile, pipelined
                    pl.BlockSpec((nNodes, H), lambda i: (0, 0)),    # W1 resident
                    pl.BlockSpec((1, H), lambda i: (0, 0)),         # b1 resident
                    pl.BlockSpec((H, nOut), lambda i: (0, 0)),      # W2 resident
                    pl.BlockSpec((1, nOut), lambda i: (0, 0)),      # b2 resident
                ],
                out_specs=pl.BlockSpec((TB, nOut), lambda i: (i, 0)),
            ),
            compiler_params=pltpu.CompilerParams(
                dimension_semantics=("parallel",),
                vmem_limit_bytes=vmem_limit,
            ),
        )(xin, w1p, b1p, w2p, b2p)
    else:
        num_ht = H // TH
        out = pl.pallas_call(
            mlp_kernel_htiled,
            out_shape=jax.ShapeDtypeStruct((Bp, nOut), out_dtype),
            grid_spec=pltpu.PrefetchScalarGridSpec(
                num_scalar_prefetch=0,
                grid=(num_bt, num_ht),
                in_specs=[
                    pl.BlockSpec((TB, nNodes), lambda i, j: (i, 0)),
                    pl.BlockSpec((nNodes, TH), lambda i, j: (0, j)),
                    pl.BlockSpec((1, TH), lambda i, j: (0, j)),
                    pl.BlockSpec((TH, nOut), lambda i, j: (j, 0)),
                    pl.BlockSpec((1, nOut), lambda i, j: (0, 0)),
                ],
                out_specs=pl.BlockSpec((TB, nOut), lambda i, j: (i, 0)),
                scratch_shapes=[pltpu.VMEM((TB, nOut), jnp.float32)],
            ),
            compiler_params=pltpu.CompilerParams(
                dimension_semantics=("parallel", "arbitrary"),
                vmem_limit_bytes=vmem_limit,
            ),
        )(xin, w1p, b1p, w2p, b2p)

    return out[:B] if Bp != B else out


# ----------------------------- init / test -----------------------------------

def init_params(key, nNodes, nlhid, nOut, dtype=jnp.float32):
    """Matches PyTorch init: weights ~ N(0, 0.02), biases zero.
    Stored as (in, out) == W.T of the PyTorch (out, in) layout."""
    k1, k2 = jax.random.split(key)
    w1 = (jax.random.normal(k1, (nNodes, nlhid), dtype) * 0.02).astype(dtype)
    b1 = jnp.zeros((nlhid,), dtype)
    w2 = (jax.random.normal(k2, (nlhid, nOut), dtype) * 0.02).astype(dtype)
    b2 = jnp.zeros((nOut,), dtype)
    return w1, b1, w2, b2


def _ref(x, w1, b1, w2, b2):
    x2 = jnp.squeeze(x, axis=2)
    return jnp.maximum(x2 @ w1 + b1, 0.0) @ w2 + b2


if __name__ == "__main__":
    key = jax.random.PRNGKey(0)
    kx, kp, kx2, kp2 = jax.random.split(key, 4)

    # ---- test 1: small shapes, exact f32 path (resident weights) ------------
    B, nNodes, nlhid, nOut = 8, 32, 64, 16
    dropout = 0.5  # inference no-op
    x = jax.random.normal(kx, (B, nNodes, 1), jnp.float32)
    w1, b1, w2, b2 = init_params(kp, nNodes, nlhid, nOut)
    ref = _ref(x, w1, b1, w2, b2)

    p_f32 = prepare_params(w1, b1, w2, b2, param_dtype=jnp.float32)  # once, at init
    out = jax.block_until_ready(mlp_forward(x, *p_f32))
    assert out.shape == (B, nOut)
    assert jnp.allclose(out, ref, atol=1e-5, rtol=1e-5)

    # ---- test 2: default bf16-input path (all generations) ------------------
    p_bf16 = prepare_params(w1, b1, w2, b2)                          # bf16 default
    out_bf16 = jax.block_until_ready(mlp_forward(x, *p_bf16))
    assert out_bf16.shape == (B, nOut)
    assert jnp.allclose(out_bf16, ref, atol=1e-2, rtol=5e-2)

    # ---- test 3: ragged batch + forced hidden-tiled fallback path -----------
    B3, nlhid3 = 80, 256
    x3 = jax.random.normal(kx2, (B3, nNodes, 1), jnp.float32)
    w1c, b1c, w2c, b2c = init_params(kp2, nNodes, nlhid3, nOut)
    ref3 = _ref(x3, w1c, b1c, w2c, b2c)
    p3 = prepare_params(w1c, b1c, w2c, b2c, param_dtype=jnp.float32)
    out3 = jax.block_until_ready(
        mlp_forward(x3, *p3, block_b=32, hidden_block=128))
    assert out3.shape == (B3, nOut)
    assert jnp.allclose(out3, ref3, atol=1e-4, rtol=1e-4)

    print("KERNEL_OK")
</pallas_src>

<mosaic_0001>
module attributes {stable_mosaic.version = 11 : i64} {
  func.func @mlp_kernel(%arg0: i32, %arg1: memref<8x32xf32, #tpu.memory_space<vmem>>, %arg2: memref<32x128xf32, #tpu.memory_space<vmem>>, %arg3: memref<1x128xf32, #tpu.memory_space<vmem>>, %arg4: memref<128x16xf32, #tpu.memory_space<vmem>>, %arg5: memref<1x16xf32, #tpu.memory_space<vmem>>, %arg6: memref<8x16xf32, #tpu.memory_space<vmem>>) attributes {dimension_semantics = [#tpu.dimension_semantics<parallel>], iteration_bounds = array<i64: 1>, scalar_prefetch = 0 : i64, scratch_operands = 0 : i64, tpu.core_type = #tpu.core_type<tc>, window_params = [{transform_indices = @transform_0, window_bounds = array<i64: 8, 32>}, {pipeline_mode = #tpu.pipeline_mode<synchronous>, transform_indices = @transform_1, window_bounds = array<i64: 32, 128>}, {pipeline_mode = #tpu.pipeline_mode<synchronous>, transform_indices = @transform_2, window_bounds = array<i64: 1, 128>}, {pipeline_mode = #tpu.pipeline_mode<synchronous>, transform_indices = @transform_3, window_bounds = array<i64: 128, 16>}, {pipeline_mode = #tpu.pipeline_mode<synchronous>, transform_indices = @transform_4, window_bounds = array<i64: 1, 16>}, {transform_indices = @transform_5, window_bounds = array<i64: 8, 16>}]} {
    %c0 = arith.constant 0 : index
    %c0_0 = arith.constant 0 : index
    %0 = vector.load %arg1[%c0, %c0_0] : memref<8x32xf32, #tpu.memory_space<vmem>>, vector<8x32xf32>
    %c0_1 = arith.constant 0 : index
    %c0_2 = arith.constant 0 : index
    %1 = vector.load %arg2[%c0_1, %c0_2] : memref<32x128xf32, #tpu.memory_space<vmem>>, vector<32x128xf32>
    %cst = arith.constant dense<0.000000e+00> : vector<8x128xf32>
    %2 = tpu.matmul %0, %1, %cst {dimension_numbers = #tpu.dot_dimension_numbers<[1], [0], [0], [1], [0, 0, 1, 1], [], []>} : vector<8x32xf32>, vector<32x128xf32>, vector<8x128xf32> -> vector<8x128xf32>
    %c0_3 = arith.constant 0 : index
    %c0_4 = arith.constant 0 : index
    %3 = vector.load %arg3[%c0_3, %c0_4] : memref<1x128xf32, #tpu.memory_space<vmem>>, vector<1x128xf32>
    %4 = vector.broadcast %3 : vector<1x128xf32> to vector<8x128xf32>
    %5 = arith.addf %2, %4 : vector<8x128xf32>
    %cst_5 = arith.constant 0.000000e+00 : f32
    %6 = vector.broadcast %cst_5 : f32 to vector<8x128xf32>
    %7 = arith.maximumf %5, %6 : vector<8x128xf32>
    %c0_6 = arith.constant 0 : index
    %c0_7 = arith.constant 0 : index
    %8 = vector.load %arg4[%c0_6, %c0_7] : memref<128x16xf32, #tpu.memory_space<vmem>>, vector<128x16xf32>
    %cst_8 = arith.constant dense<0.000000e+00> : vector<8x16xf32>
    %9 = tpu.matmul %7, %8, %cst_8 {dimension_numbers = #tpu.dot_dimension_numbers<[1], [0], [0], [1], [0, 0, 1, 1], [], []>} : vector<8x128xf32>, vector<128x16xf32>, vector<8x16xf32> -> vector<8x16xf32>
    %c0_9 = arith.constant 0 : index
    %c0_10 = arith.constant 0 : index
    %10 = vector.load %arg5[%c0_9, %c0_10] : memref<1x16xf32, #tpu.memory_space<vmem>>, vector<1x16xf32>
    %11 = vector.broadcast %10 : vector<1x16xf32> to vector<8x16xf32>
    %12 = arith.addf %9, %11 : vector<8x16xf32>
    %c0_11 = arith.constant 0 : index
    %c0_12 = arith.constant 0 : index
    %13 = vector.load %arg6[%c0_11, %c0_12] : memref<8x16xf32, #tpu.memory_space<vmem>>, vector<8x16xf32>
    tpu.vector_store %arg6[%c0_11, %c0_12], %12 {strides = array<i32>} : memref<8x16xf32, #tpu.memory_space<vmem>>, vector<8x16xf32>,
    return
  }
  func.func @transform_0(%arg0: i32) -> (i32, i32) {
    %c0_i32 = arith.constant 0 : i32
    %c0_i32_0 = arith.constant 0 : i32
    return %arg0, %c0_i32 : i32, i32
  }
  func.func @transform_1(%arg0: i32) -> (i32, i32) {
    %c0_i32 = arith.constant 0 : i32
    %c0_i32_0 = arith.constant 0 : i32
    %c0_i32_1 = arith.constant 0 : i32
    return %c0_i32, %c0_i32_0 : i32, i32
  }
  func.func @transform_2(%arg0: i32) -> (i32, i32) {
    %c0_i32 = arith.constant 0 : i32
    %c0_i32_0 = arith.constant 0 : i32
    %c0_i32_1 = arith.constant 0 : i32
    return %c0_i32, %c0_i32_0 : i32, i32
  }
  func.func @transform_3(%arg0: i32) -> (i32, i32) {
    %c0_i32 = arith.constant 0 : i32
    %c0_i32_0 = arith.constant 0 : i32
    %c0_i32_1 = arith.constant 0 : i32
    return %c0_i32, %c0_i32_0 : i32, i32
  }
  func.func @transform_4(%arg0: i32) -> (i32, i32) {
    %c0_i32 = arith.constant 0 : i32
    %c0_i32_0 = arith.constant 0 : i32
    %c0_i32_1 = arith.constant 0 : i32
    return %c0_i32, %c0_i32_0 : i32, i32
  }
  func.func @transform_5(%arg0: i32) -> (i32, i32) {
    %c0_i32 = arith.constant 0 : i32
    %c0_i32_0 = arith.constant 0 : i32
    return %arg0, %c0_i32 : i32, i32
  }
}

</mosaic_0001>

<bundles_post_ra>
// kernel: mlp_forward.1
= control target key start
LH: loop header
LB: loop body
LE: loop exit
PB: predicated region body
PF: predicated region fallthrough
CT: control target
= control target key end

     0   :  { %v346_v3 = vmov 0.0|0.0   ;;  %vm347_vm0 = vmmov 0   ;;  %v348_v6 = vmov 0.0   ;;  %s461_s0 = inlined_call_operand.vmem [shape: f32[8,32], index: 0, kind: input, shape index: {}]   ;;  %s462_s1 = inlined_call_operand.vmem [shape: f32[32,128], index: 1, kind: input, shape index: {}]   ;;  %s463_s2 = inlined_call_operand.vmem [shape: f32[1,128], index: 2, kind: input, shape index: {}]   ;;  %s464_s3 = inlined_call_operand.vmem [shape: f32[128,16], index: 3, kind: input, shape index: {}]   ;;  %s465_s4 = inlined_call_operand.vmem [shape: f32[1,16], index: 4, kind: input, shape index: {}]   ;;  %s466_s5 = inlined_call_operand.hbm [shape: f32[8,16], index: 5, kind: output, shape index: {}]  }
   0x1   :  { %v22_v0 = vld [vmem:[%s462_s1] sm:$0xff]  ;;  %v23_v1 = vld [vmem:[%s462_s1 + $0x8] sm:$0xff]  ;;  %v24_v2 = vld [vmem:[%s462_s1 + $0x10] sm:$0xff]  ;;  %288 = vmatprep.subr.bf16.mxu0 %v346_v3  ;;  %250 = vmatprep.mubr.msk.f32.mxu0 %vm347_vm0, %v348_v6 }
   0x2   :  { %v289_v4 = vpack.c.bf16 %v23_v1, %v22_v0  ;;  %v25_v5 = vld [vmem:[%s462_s1 + $0x18] sm:$0xff]  ;;  %v108_v7 = vld [vmem:[%s464_s3] sm:$0xff]  ;;  %294 = vmatprep.subr.bf16.mxu1 %v346_v3  ;;  %v109_v8 = vld [vmem:[%s464_s3 + $0x8] sm:$0xff]  ;;  %285 = vmatprep.mubr.msk.f32.mxu1 %vm347_vm0, %v348_v6 }
   0x3   :  { %v110_v9 = vld [vmem:[%s464_s3 + $0x10] sm:$0xff]  ;;  %v111_v10 = vld [vmem:[%s464_s3 + $0x18] sm:$0xff]  ;;  %v292_v11 = vpack.c.bf16 %v25_v5, %v24_v2  ;;  %v295_v12 = vpack.c.bf16 %v109_v8, %v108_v7  ;;  %v112_v14 = vld [vmem:[%s464_s3 + $0x20] sm:$0xff] }
   0x4   :  { %290 = vmatpush3.bf16.msra.mxu0 %v289_v4  ;;  %v298_v13 = vpack.c.bf16 %v111_v10, %v110_v9  ;;  %v113_v15 = vld [vmem:[%s464_s3 + $0x28] sm:$0xff] }
   0x5   :  { %291 = vmatprep.subr.bf16.mxu0 %v346_v3  ;;  %296 = vmatpush3.bf16.msra.mxu1 %v295_v12 }
   0x6   :  { %297 = vmatprep.subr.bf16.mxu1 %v346_v3 }
   0x7   :  { %10 = vsyncpa [#allocation3], 0  ;;  %v21_v16 = vld [vmem:[%s461_s0] sm:$0xff]  ;;  %vm33_vm1 = vcmask 261120   ;;  %v301_v17 = vpack.c.bf16 %v113_v15, %v112_v14  ;;  %v114_v18 = vld [vmem:[%s464_s3 + $0x30] sm:$0xff]  ;;  %s349_s11 = smov [#allocation2]  }
   0x8   :  { %293 = vmatpush3.bf16.msra.mxu0 %v292_v11  ;;  %v115_v19 = vld [vmem:[%s464_s3 + $0x38] sm:$0xff]  ;;  %v116_v21 = vld [vmem:[%s464_s3 + $0x40] sm:$0xff]  ;;  %v117_v22 = vld [vmem:[%s464_s3 + $0x48] sm:$0xff]  ;;  %s209_s12 = sshll.u32 %s349_s11, 4  ;;  %vm201_vm2 = vcmask 130048   ;;  %s210_s12 = int_to_ptr.vmem [resolvable:$true] %s209_s12 }
   0x9   :  { %299 = vmatpush3.bf16.msra.mxu1 %v298_v13  ;;  %v304_v20 = vpack.c.bf16 %v115_v19, %v114_v18  ;;  %v307_v23 = vpack.c.bf16 %v117_v22, %v116_v21  ;;  %v118_v24 = vld [vmem:[%s464_s3 + $0x50] sm:$0xff]  ;;  %v119_v25 = vld [vmem:[%s464_s3 + $0x58] sm:$0xff]  ;;  %v120_v27 = vld [vmem:[%s464_s3 + $0x60] sm:$0xff]  ;;  %p327_p1 = scmp.lt.s32.totalorder %s210_s12, %s210_s12 }
   0xa   :  { %300 = vmatprep.subr.bf16.mxu1 %v346_v3  ;;  %v310_v26 = vpack.c.bf16 %v119_v25, %v118_v24  ;;  %v121_v28 = vld [vmem:[%s464_s3 + $0x68] sm:$0xff]  ;;  %v122_v30 = vld [vmem:[%s464_s3 + $0x70] sm:$0xff]  ;;  %v123_v31 = vld [vmem:[%s464_s3 + $0x78] sm:$0xff]  ;;  %s322_s3 = scalar_lea.vmem %s210_s12, 128 }
   0xb   :  { %251 = vmatmul.mubr.msk.f32.vlgmr.msra.gmra.mrb[0].mxu0 %vm33_vm1, %v21_v16  ;;  %v313_v29 = vpack.c.bf16 %v121_v28, %v120_v27  ;;  %v316_v32 = vpack.c.bf16 %v123_v31, %v122_v30  ;;  %v217_v33 = vld [vmem:[%s463_s2] ss:$0 sm:$0xff]  ;;  %p323_p0 = scmp.ne.s32.totalorder %s210_s12, %s322_s3  ;;  %p328_p2 = scmp.lt.s32.totalorder %s322_s3, %s322_s3 }
   0xc   :  { %v219_v38 = vld [vmem:[%s465_s4] ss:$0 sm:$0xff] }
   0xd   :  { %302 = vmatpush3.bf16.msra.mxu1 %v301_v17  ;;  %p329_p3 = por %p328_p2, %p327_p1 }
   0xe   :  { %303 = vmatprep.subr.bf16.mxu1 %v346_v3 }
   0xf   :  { %p330_p4 = pnand %p329_p3, %p323_p0 }
  0x11   :  { %305 = vmatpush3.bf16.msra.mxu1 %v304_v20 }
  0x12   :  { %306 = vmatprep.subr.bf16.mxu1 %v346_v3 }
  0x15   :  { %308 = vmatpush3.bf16.msra.mxu1 %v307_v23 }
  0x16   :  { %309 = vmatprep.subr.bf16.mxu1 %v346_v3 }
  0x19   :  { %311 = vmatpush3.bf16.msra.mxu1 %v310_v26 }
  0x1a   :  { %312 = vmatprep.subr.bf16.mxu1 %v346_v3 }
  0x1d   :  { %314 = vmatpush3.bf16.msra.mxu1 %v313_v29 }
  0x1e   :  { %315 = vmatprep.subr.bf16.mxu1 %v346_v3 }
  0x21   :  { %317 = vmatpush3.bf16.msra.mxu1 %v316_v32 }
  0xde   :  { %v103_v34 = vpop.f32.mrb[0].mxu0 }
  0xdf   :  { %v104_v35 = vadd.f32 %v217_v33, %v103_v34  ;;  %v252_v36 = vpop.f32.mrb[1].mxu0 }
  0xe1   :  { %v107_v37 = vmax.f32 %v104_v35, 0.0 }
  0xe3   :  { %286 = vmatmul.mubr.f32.vlgmr.msra.gmra.mrb[0].mxu1 %v107_v37 }
 0x1b6   :  { %v197_v39 = vpop.f32.mrb[0].mxu1 }
 0x1b7   :  { %v198_v40 = vadd.f32 %v219_v38, %v197_v39  ;;  %v287_v41 = vpop.f32.mrb[1].mxu1 }
 0x1b9   :  { %202 = vst.msk [vmem:[#allocation2] sm:$0xff] %vm201_vm2, %v198_v40 }
 0x1ba   :  { %333 = shalt.err (!%p330_p4)
}
 0x1bb   :  { %s334_s14 = scalar_lea.hbm %s466_s5, 128 }
 0x1bc   :  { %p335_p5 = scmp.ne.s32.totalorder %s466_s5, %s334_s14  ;;  %p338_p6 = scmp.lt.u32.totalorder %s334_s14, %s466_s5 }
 0x1be   :  { %p340_p7 = pnand %p338_p6, %p335_p5 }
 0x1c0   :  { %343 = shalt.err (!%p340_p7)
}
 0x1c1   :  { %212 = dma.vmem_to_hbm [thread:$0]  %s210_s12, 128, %s466_s5, [#allocation3]  }
 0x1c2   :  { %344 = dma.done.wait [#allocation3], 128  }
 0x1c3   :  { %345 = vsyncadd [#allocation3], 4294967168 }
 0x1c4   :  { %216 = vsyncpa [#allocation3], 1 }

</bundles_post_ra>
